<compile_context>
chip_gen: v7x
topology: tpu7x:2x2x1
jax: 0.10.0
libtpu: 0.0.40
codegen_flags: <defaults>
</compile_context>

<pallas_src>
import jax
import jax.numpy as jnp
from jax.experimental import pallas as pl
from jax.experimental.pallas import tpu as pltpu

EPS = 1e-5
_TARGET_TILE_BYTES = 4 << 20   # ~4 MiB x tiles already reach >85% of HBM roofline;
                               # smaller tiles leave grid steps for pipelining/2-TC.


def _round_up(x, m):
    return ((x + m - 1) // m) * m


# --------------------------------------------------------------------------- #
# Kernels
# --------------------------------------------------------------------------- #
def _add_bn_fused_kernel(x_ref, wb_ref, o_ref):
    """Single pass: x block (N, tc, HW) resident; per-channel stats + fused FMA."""
    x = x_ref[...].astype(jnp.float32)                           # (N, tc, HW)
    rcount = 1.0 / float(x.shape[0] * x.shape[2])
    mean = jnp.sum(x, axis=(0, 2), keepdims=True) * rcount       # (1, tc, 1)
    msq = jnp.sum(x * x, axis=(0, 2), keepdims=True) * rcount
    var = jnp.maximum(msq - mean * mean, 0.0)                    # biased variance
    inv = jax.lax.rsqrt(var + EPS)

    wb = wb_ref[...]                                             # (tc, 2) f32
    w = wb[:, 0:1][None, :, :]                                   # (1, tc, 1)
    b = wb[:, 1:2][None, :, :]
    scale = w * inv
    shift = b - scale * mean
    o_ref[...] = (x * scale + shift).astype(o_ref.dtype)


def _bn_stats_kernel(x_ref, sum_ref, ssq_ref):
    """Two-pass, pass 1: accumulate per-channel sum / sum-of-squares over batch."""
    @pl.when(pl.program_id(1) == 0)
    def _():
        sum_ref[...] = jnp.zeros_like(sum_ref)
        ssq_ref[...] = jnp.zeros_like(ssq_ref)

    x = x_ref[0].astype(jnp.float32)                             # (tc, HW)
    sum_ref[...] += jnp.sum(x, axis=1, keepdims=True)            # (tc, 1)
    ssq_ref[...] += jnp.sum(x * x, axis=1, keepdims=True)


def _bn_apply_kernel(x_ref, ss_ref, o_ref):
    """Two-pass, pass 2: y = x*scale + shift with precomputed per-channel params."""
    x = x_ref[...].astype(jnp.float32)                           # (1, tc, HW)
    ss = ss_ref[...]                                             # (tc, 2)
    scale = ss[:, 0:1][None, :, :]
    shift = ss[:, 1:2][None, :, :]
    o_ref[...] = (x * scale + shift).astype(o_ref.dtype)


# --------------------------------------------------------------------------- #
# Tiling / VMEM planning
# --------------------------------------------------------------------------- #
def _vmem_budget():
    try:
        cap = int(pltpu.get_tpu_info().vmem_capacity_bytes)
    except Exception:
        cap = 64 << 20                       # conservative: v7x per-TC VMEM
    # ~44 MiB on v7x (64 MiB physical), up to 96 MiB on v5e/v6e (128 MiB).
    return min(int(cap * 0.70), 96 << 20)


def _channel_tile_candidates(C):
    cands = [d for d in range(8, C + 1, 8) if C % d == 0]
    if C not in cands:
        cands.append(C)                      # full channel extent always legal
    return sorted(set(cands))


def _single_pass_vmem_need(N, tc, HW, itemsize):
    hw_pad = _round_up(HW, 128)              # lane padding
    tc_pad = _round_up(tc, 8)                # sublane padding
    io_tile = N * tc_pad * hw_pad * itemsize # one x (or y) buffer, padded
    f32_tile = N * tc_pad * hw_pad * 4       # in-kernel f32 upcast / temp
    wb_tile = tc_pad * 128 * 4               # (tc, 2) occupies 128 lanes
    need = 4 * io_tile + 2 * f32_tile + 4 * wb_tile   # double-buffered in + out
    return int(need * 1.15) + (2 << 20)      # slack + Mosaic internal scratch


def _choose_tc_single(N, C, HW, itemsize, budget):
    fitting = [tc for tc in _channel_tile_candidates(C)
               if _single_pass_vmem_need(N, tc, HW, itemsize) <= budget]
    if not fitting:
        return None                          # route to two-pass path
    hw_pad = _round_up(HW, 128)
    per_ch_io = N * hw_pad * itemsize
    # Prefer tiles that (a) stay near ~4 MiB and (b) give >= 4 grid steps so
    # DMA/compute overlap exists and both v7x TensorCores get channel tiles.
    cap = max(1, min(_TARGET_TILE_BYTES // per_ch_io, C // 4))
    preferred = [tc for tc in fitting if tc <= cap]
    return preferred[-1] if preferred else fitting[0]


def _two_pass_vmem_need(tc, HW, itemsize):
    hw_pad = _round_up(HW, 128)
    tc_pad = _round_up(tc, 8)
    io_tile = tc_pad * hw_pad * itemsize     # one (1, tc, HW) buffer
    f32_tile = tc_pad * hw_pad * 4
    small = tc_pad * 128 * 4
    need = 4 * io_tile + 2 * f32_tile + 8 * small
    return int(need * 1.15) + (2 << 20)


def _choose_tc_two_pass(C, HW, itemsize, budget):
    fitting = [tc for tc in _channel_tile_candidates(C)
               if _two_pass_vmem_need(tc, HW, itemsize) <= budget]
    if not fitting:
        return None
    hw_pad = _round_up(HW, 128)
    cap = max(1, (2 * _TARGET_TILE_BYTES) // (hw_pad * itemsize))
    preferred = [tc for tc in fitting if tc <= cap]
    return preferred[-1] if preferred else fitting[0]


# --------------------------------------------------------------------------- #
# Wrapper
# --------------------------------------------------------------------------- #
def add_bn_2d_pallas(x_nchw, params, tc=None, force_two_pass=False):
    """Forward pass of add_BN_2d. x_nchw: (N, C, H, W); params: 8 (C,) vectors."""
    N, C, H, W = x_nchw.shape
    HW = H * W
    x3 = x_nchw.reshape(N, C, HW)            # free reshape, keep input dtype
    itemsize = x3.dtype.itemsize
    budget = _vmem_budget()

    # additive_decomposed_weight forward (HM70A / wrist branches), computed once.
    w = (params["w_base"] *
         jax.nn.sigmoid(params["w_ultra"] + params["w_hm70a"] * params["w_wrist"])
         ).astype(jnp.float32)
    b = (params["b_base"] *
         jax.nn.sigmoid(params["b_ultra"] + params["b_hm70a"] * params["b_wrist"])
         ).astype(jnp.float32)

    if force_two_pass:
        tc = None
    elif tc is None:
        tc = _choose_tc_single(N, C, HW, itemsize, budget)
    else:
        assert C % tc == 0, "channel tile must divide C"

    # ----------------------- single-pass (channel-slab) path -----------------
    if tc is not None:
        wb = jnp.stack([w, b], axis=1)                                # (C, 2)
        need = _single_pass_vmem_need(N, tc, HW, itemsize)
        y3 = pl.pallas_call(
            _add_bn_fused_kernel,
            out_shape=jax.ShapeDtypeStruct((N, C, HW), x3.dtype),
            grid=(C // tc,),
            in_specs=[pl.BlockSpec((N, tc, HW), lambda c: (0, c, 0)),
                      pl.BlockSpec((tc, 2), lambda c: (c, 0))],
            out_specs=pl.BlockSpec((N, tc, HW), lambda c: (0, c, 0)),
            compiler_params=pltpu.CompilerParams(
                dimension_semantics=("parallel",),
                vmem_limit_bytes=max(need, 32 << 20)),
            cost_estimate=pl.CostEstimate(
                flops=8 * N * C * HW,
                transcendentals=0,
                bytes_accessed=2 * N * C * HW * itemsize),
        )(x3, wb)
        return y3.reshape(N, C, H, W)

    # --------------------------- two-pass fallback ---------------------------
    tc2 = _choose_tc_two_pass(C, HW, itemsize, budget)
    if tc2 is None:
        # TODO(synk): also tile the H*W axis (extra "arbitrary" grid axis) for
        # shapes where even a single-sample, 8-channel slab exceeds VMEM.
        raise NotImplementedError("feature map too large for current tiling")
    need2 = _two_pass_vmem_need(tc2, HW, itemsize)
    grid2 = (C // tc2, N)

    s, q = pl.pallas_call(
        _bn_stats_kernel,
        out_shape=(jax.ShapeDtypeStruct((C, 1), jnp.float32),
                   jax.ShapeDtypeStruct((C, 1), jnp.float32)),
        grid=grid2,
        in_specs=[pl.BlockSpec((1, tc2, HW), lambda c, n: (n, c, 0))],
        out_specs=(pl.BlockSpec((tc2, 1), lambda c, n: (c, 0)),
                   pl.BlockSpec((tc2, 1), lambda c, n: (c, 0))),
        compiler_params=pltpu.CompilerParams(
            dimension_semantics=("parallel", "arbitrary"),
            vmem_limit_bytes=max(need2, 32 << 20)),
        cost_estimate=pl.CostEstimate(
            flops=3 * N * C * HW, transcendentals=0,
            bytes_accessed=N * C * HW * itemsize),
    )(x3)

    count = float(N * HW)
    mean = s[:, 0] / count
    var = jnp.maximum(q[:, 0] / count - mean * mean, 0.0)
    inv = jax.lax.rsqrt(var + EPS)
    scale = w * inv
    shift = b - scale * mean
    ss = jnp.stack([scale, shift], axis=1).astype(jnp.float32)        # (C, 2)

    y3 = pl.pallas_call(
        _bn_apply_kernel,
        out_shape=jax.ShapeDtypeStruct((N, C, HW), x3.dtype),
        grid=grid2,
        in_specs=[pl.BlockSpec((1, tc2, HW), lambda c, n: (n, c, 0)),
                  pl.BlockSpec((tc2, 2), lambda c, n: (c, 0))],
        out_specs=pl.BlockSpec((1, tc2, HW), lambda c, n: (n, c, 0)),
        compiler_params=pltpu.CompilerParams(
            dimension_semantics=("parallel", "parallel"),
            vmem_limit_bytes=max(need2, 32 << 20)),
        cost_estimate=pl.CostEstimate(
            flops=2 * N * C * HW, transcendentals=0,
            bytes_accessed=2 * N * C * HW * itemsize),
    )(x3, ss)
    return y3.reshape(N, C, H, W)


# --------------------------------------------------------------------------- #
# Init + pure-JAX reference
# --------------------------------------------------------------------------- #
def init_params(key, channels, scale=1.0):
    """Matches add_BN_2d.__init__: weight decomp value=1, bias decomp value=0.01."""
    kw, kb = jax.random.split(key)
    ones = jnp.ones((channels,), jnp.float32)
    return {
        "w_base": jax.random.normal(kw, (channels,), jnp.float32),
        "w_ultra": 1.0 * ones,
        "w_hm70a": 1.0 * scale * ones,
        "w_wrist": 1.0 * scale * ones,
        "b_base": jax.random.normal(kb, (channels,), jnp.float32),
        "b_ultra": 0.01 * ones,
        "b_hm70a": 0.01 * scale * ones,
        "b_wrist": 0.01 * scale * ones,
    }


def add_bn_2d_ref(x, p):
    """Pure-JAX reference for verification."""
    mean = jnp.mean(x, axis=(0, 2, 3), keepdims=True)
    var = jnp.mean((x - mean) ** 2, axis=(0, 2, 3), keepdims=True)
    xn = (x - mean) / jnp.sqrt(var + EPS)
    w = p["w_base"] * jax.nn.sigmoid(p["w_ultra"] + p["w_hm70a"] * p["w_wrist"])
    b = p["b_base"] * jax.nn.sigmoid(p["b_ultra"] + p["b_hm70a"] * p["b_wrist"])
    return w.reshape(1, -1, 1, 1) * xn + b.reshape(1, -1, 1, 1)


if __name__ == "__main__":
    key = jax.random.PRNGKey(0)
    kx, kp, kx2, kp2, kx3, kp3 = jax.random.split(key, 6)

    # 1) Small module-consistent shape (single full-channel block).
    N, C, H, W = 2, 4, 16, 16
    x = jax.random.normal(kx, (N, C, H, W), jnp.float32)
    params = init_params(kp, C, scale=1.0)
    y = jax.block_until_ready(add_bn_2d_pallas(x, params))
    y_ref = add_bn_2d_ref(x, params)
    assert y.shape == (N, C, H, W)
    assert jnp.max(jnp.abs(y - y_ref)) < 1e-4, "mismatch (single tile)"

    # 2) Channel-tiled grid (tc=8 -> grid=(2,)) exercising pipelined DMA.
    N2, C2, H2, W2 = 2, 16, 16, 16
    x2 = jax.random.normal(kx2, (N2, C2, H2, W2), jnp.float32)
    params2 = init_params(kp2, C2, scale=1.0)
    y2 = jax.block_until_ready(add_bn_2d_pallas(x2, params2, tc=8))
    y2_ref = add_bn_2d_ref(x2, params2)
    assert jnp.max(jnp.abs(y2 - y2_ref)) < 1e-4, "mismatch (tiled grid)"

    # 3) Two-pass fallback path (stats accumulation + fused apply), forced.
    y2b = jax.block_until_ready(add_bn_2d_pallas(x2, params2, force_two_pass=True))
    assert jnp.max(jnp.abs(y2b - y2_ref)) < 1e-4, "mismatch (two-pass path)"

    # 4) bf16 I/O path (half the HBM traffic; stats still accumulated in f32).
    x3 = jax.random.normal(kx3, (N, C, H, W), jnp.float32).astype(jnp.bfloat16)
    params3 = init_params(kp3, C, scale=1.0)
    y3 = jax.block_until_ready(add_bn_2d_pallas(x3, params3))
    y3_ref = add_bn_2d_ref(x3.astype(jnp.float32), params3)
    assert y3.dtype == jnp.bfloat16
    assert jnp.max(jnp.abs(y3.astype(jnp.float32) - y3_ref)) < 5e-2, "mismatch (bf16)"

    print("KERNEL_OK")
</pallas_src>

<mosaic_0001>
module attributes {stable_mosaic.version = 11 : i64} {
  func.func @_add_bn_fused_kernel(%arg0: i32, %arg1: memref<2x4x256xf32, #tpu.memory_space<vmem>>, %arg2: memref<4x2xf32, #tpu.memory_space<vmem>>, %arg3: memref<2x4x256xf32, #tpu.memory_space<vmem>>) attributes {dimension_semantics = [#tpu.dimension_semantics<parallel>], iteration_bounds = array<i64: 1>, scalar_prefetch = 0 : i64, scratch_operands = 0 : i64, tpu.core_type = #tpu.core_type<tc>, window_params = [{transform_indices = @transform_0, window_bounds = array<i64: 2, 4, 256>}, {transform_indices = @transform_1, window_bounds = array<i64: 4, 2>}, {transform_indices = @transform_2, window_bounds = array<i64: 2, 4, 256>}]} {
    %c0 = arith.constant 0 : index
    %c0_0 = arith.constant 0 : index
    %c0_1 = arith.constant 0 : index
    %0 = vector.load %arg1[%c0, %c0_0, %c0_1] : memref<2x4x256xf32, #tpu.memory_space<vmem>>, vector<2x4x256xf32>
    %cst = arith.constant dense<0.000000e+00> : vector<4xf32>
    %1 = vector.multi_reduction <add>, %0, %cst [0, 2] : vector<2x4x256xf32> to vector<4xf32>
    %2 = vector.shape_cast %1 : vector<4xf32> to vector<1x4x1xf32>
    %cst_2 = arith.constant 0.001953125 : f32
    %3 = vector.broadcast %cst_2 : f32 to vector<1x4x1xf32>
    %4 = arith.mulf %2, %3 : vector<1x4x1xf32>
    %5 = arith.mulf %0, %0 : vector<2x4x256xf32>
    %cst_3 = arith.constant dense<0.000000e+00> : vector<4xf32>
    %6 = vector.multi_reduction <add>, %5, %cst_3 [0, 2] : vector<2x4x256xf32> to vector<4xf32>
    %7 = vector.shape_cast %6 : vector<4xf32> to vector<1x4x1xf32>
    %cst_4 = arith.constant 0.001953125 : f32
    %8 = vector.broadcast %cst_4 : f32 to vector<1x4x1xf32>
    %9 = arith.mulf %7, %8 : vector<1x4x1xf32>
    %10 = arith.mulf %4, %4 : vector<1x4x1xf32>
    %11 = arith.subf %9, %10 : vector<1x4x1xf32>
    %cst_5 = arith.constant 0.000000e+00 : f32
    %12 = vector.broadcast %cst_5 : f32 to vector<1x4x1xf32>
    %13 = arith.maximumf %11, %12 : vector<1x4x1xf32>
    %cst_6 = arith.constant 9.99999974E-6 : f32
    %14 = vector.broadcast %cst_6 : f32 to vector<1x4x1xf32>
    %15 = arith.addf %13, %14 : vector<1x4x1xf32>
    %16 = math.rsqrt %15 : vector<1x4x1xf32>
    %c0_7 = arith.constant 0 : index
    %c0_8 = arith.constant 0 : index
    %17 = vector.load %arg2[%c0_7, %c0_8] : memref<4x2xf32, #tpu.memory_space<vmem>>, vector<4x2xf32>
    %18 = vector.extract_strided_slice %17 {offsets = [0, 0], sizes = [4, 1], strides = [1, 1]} : vector<4x2xf32> to vector<4x1xf32>
    %19 = vector.shape_cast %18 : vector<4x1xf32> to vector<1x4x1xf32>
    %20 = vector.extract_strided_slice %17 {offsets = [0, 1], sizes = [4, 1], strides = [1, 1]} : vector<4x2xf32> to vector<4x1xf32>
    %21 = vector.shape_cast %20 : vector<4x1xf32> to vector<1x4x1xf32>
    %22 = arith.mulf %19, %16 : vector<1x4x1xf32>
    %23 = arith.mulf %22, %4 : vector<1x4x1xf32>
    %24 = arith.subf %21, %23 : vector<1x4x1xf32>
    %25 = vector.broadcast %22 : vector<1x4x1xf32> to vector<2x4x256xf32>
    %26 = arith.mulf %0, %25 : vector<2x4x256xf32>
    %27 = vector.broadcast %24 : vector<1x4x1xf32> to vector<2x4x256xf32>
    %28 = arith.addf %26, %27 : vector<2x4x256xf32>
    %c0_9 = arith.constant 0 : index
    %c0_10 = arith.constant 0 : index
    %c0_11 = arith.constant 0 : index
    %29 = vector.load %arg3[%c0_9, %c0_10, %c0_11] : memref<2x4x256xf32, #tpu.memory_space<vmem>>, vector<2x4x256xf32>
    tpu.vector_store %arg3[%c0_9, %c0_10, %c0_11], %28 {strides = array<i32>} : memref<2x4x256xf32, #tpu.memory_space<vmem>>, vector<2x4x256xf32>,
    return
  }
  func.func @transform_0(%arg0: i32) -> (i32, i32, i32) {
    %c0_i32 = arith.constant 0 : i32
    %c0_i32_0 = arith.constant 0 : i32
    %c0_i32_1 = arith.constant 0 : i32
    return %c0_i32, %arg0, %c0_i32_0 : i32, i32, i32
  }
  func.func @transform_1(%arg0: i32) -> (i32, i32) {
    %c0_i32 = arith.constant 0 : i32
    %c0_i32_0 = arith.constant 0 : i32
    return %arg0, %c0_i32 : i32, i32
  }
  func.func @transform_2(%arg0: i32) -> (i32, i32, i32) {
    %c0_i32 = arith.constant 0 : i32
    %c0_i32_0 = arith.constant 0 : i32
    %c0_i32_1 = arith.constant 0 : i32
    return %c0_i32, %arg0, %c0_i32_0 : i32, i32, i32
  }
}

</mosaic_0001>

<bundles_post_ra>
// kernel: tpu_custom_call.1
= control target key start
LH: loop header
LB: loop body
LE: loop exit
PB: predicated region body
PF: predicated region fallthrough
CT: control target
= control target key end

     0   :  { %7 = vsyncpa [#allocation3], 0  ;;  %s249_s0 = inlined_call_operand.hbm [shape: f32[2,4,256], index: 0, kind: input, shape index: {}]   ;;  %s250_s1 = inlined_call_operand.vmem [shape: f32[4,2], index: 1, kind: input, shape index: {}]   ;;  %s251_s2 = inlined_call_operand.hbm [shape: f32[2,4,256], index: 2, kind: output, shape index: {}]  }
   0x1   :  { %8 = vsyncpa [#allocation4], 0  ;;  %s185_s9 = smov [#allocation2]   ;;  %s137_s13 = scalar_lea.hbm %s249_s0, 256 }
   0x2   :  { %s14_s10 = sshll.u32 %s185_s9, 4  ;;  %p138_p0 = scmp.ne.s32.totalorder %s249_s0, %s137_s13  ;;  %s15_s10 = int_to_ptr.vmem [resolvable:$true] %s14_s10 }
   0x3   :  { %p141_p1 = scmp.lt.u32.totalorder %s137_s13, %s249_s0 }
   0x5   :  { %p143_p2 = pnand %p141_p1, %p138_p0 }
   0x7   :  { %146 = shalt.err (!%p143_p2)
}
   0x8   :  { %s147_s18 = scalar_lea.vmem %s15_s10, 256  ;;  %p152_p4 = scmp.lt.s32.totalorder %s15_s10, %s15_s10 }
   0x9   :  { %p148_p3 = scmp.ne.s32.totalorder %s15_s10, %s147_s18  ;;  %p153_p5 = scmp.lt.s32.totalorder %s147_s18, %s147_s18 }
   0xb   :  { %p154_p6 = por %p153_p5, %p152_p4 }
   0xd   :  { %p155_p7 = pnand %p154_p6, %p148_p3 }
   0xf   :  { %158 = shalt.err (!%p155_p7)
}
  0x10   :  { %s186_s19 = smov 128   ;;  %s187_s20 = smov 8  }
  0x11   :  { %20 = dma.hbm_to_vmem [thread:$0]  %s249_s0, 256, %s15_s10, [#allocation3], %s186_s19, %s186_s19, %s187_s20  }
  0x12   :  { %181 = dma.done.wait [#allocation3], 256  }
  0x13   :  { %182 = vsyncadd [#allocation3], 4294967040  ;;  %vm34_vm0 = vcmask 1043456   ;;  %v26_v0 = vld [vmem:[#allocation2] sm:$0xff]  ;;  %v27_v1 = vld [vmem:[#allocation2 + $0x8] sm:$0xff]  ;;  %v188_v22 = vmov 0   ;;  %v83_v40 = vlaneseq }
  0x14   :  { %v30_v2 = vcombine.high %v26_v0, %v26_v0  ;;  %v31_v3 = vcombine.high %v27_v1, %v27_v1  ;;  %v35_v4 = vsel %vm34_vm0, %v26_v0, 0.0  ;;  %v45_v5 = vmul.f32 %v26_v0, %v26_v0  ;;  %131 = vset.pattern.permute.xlu1 %v188_v22  ;;  %v68_v32 = vld [vmem:[%s250_s1] sm:$0xf]  ;;  %s190_s24 = smov 1   ;;  %s192_s25 = smov [#allocation5]  }
  0x15   :  { %v46_v6 = vmul.f32 %v27_v1, %v27_v1  ;;  %v38_v8 = vsel %vm34_vm0, %v27_v1, 0.0  ;;  %v189_v31 = vmov 1   ;;  %v191_v38 = vmov 839922192   ;;  %s111_s1 = sshll.u32 %s192_s25, 4  ;;  %s112_s1 = int_to_ptr.vmem [resolvable:$true] %s111_s1 }
  0x16   :  { %v36_v7 = vsel %vm34_vm0, %v30_v2, 0.0  ;;  %v49_v10 = vcombine.high %v45_v5, %v45_v5  ;;  %v53_v12 = vsel %vm34_vm0, %v45_v5, 0.0  ;;  %v40_v13 = vsel %vm34_vm0, %v31_v3, 0.0  ;;  %132 = vset.pattern.permute.xlu0 %v189_v31  ;;  %s159_s26 = scalar_lea.vmem %s112_s1, 256  ;;  %p164_p9 = scmp.lt.s32.totalorder %s112_s1, %s112_s1 }
  0x17   :  { %v37_v9 = vadd.f32 %v36_v7, %v35_v4  ;;  %v50_v11 = vcombine.high %v46_v6, %v46_v6  ;;  %v56_v16 = vsel %vm34_vm0, %v46_v6, 0.0  ;;  %v81_v39 = vunpack.c.l.s4 %v191_v38  ;;  %p160_p8 = scmp.ne.s32.totalorder %s112_s1, %s159_s26  ;;  %p165_p10 = scmp.lt.s32.totalorder %s159_s26, %s159_s26 }
  0x18   :  { %v54_v15 = vsel %vm34_vm0, %v49_v10, 0.0  ;;  %v84_v42 = vshrl.u32 %v83_v40, 7 }
  0x19   :  { %v39_v14 = vadd.f32 %v38_v8, %v37_v9  ;;  %v55_v17 = vadd.f32 %v54_v15, %v53_v12  ;;  %v58_v19 = vsel %vm34_vm0, %v50_v11, 0.0  ;;  %v82_v41 = vunpack.c.0.s8 %v81_v39  ;;  %p166_p11 = por %p165_p10, %p164_p9 }
  0x1b   :  { %v41_v18 = vadd.f32 %v40_v13, %v39_v14  ;;  %v57_v20 = vadd.f32 %v56_v16, %v55_v17  ;;  %v85_v43 = vsub.s32 %v82_v41, %v84_v42  ;;  %p167_p12 = pnand %p166_p11, %p160_p8 }
  0x1d   :  { %42 = vadd.xlane.f32.xlu0 %v41_v18  ;;  %v59_v21 = vadd.f32 %v58_v19, %v57_v20 }
  0x21   :  { %60 = vadd.xlane.f32.xlu0 %v59_v21 }
  0xaa   :  { %v43_v23 = vpop.xlane.xlu0 %42 }
  0xab   :  { %v44_v24 = vmul.f32 0.001953125, %v43_v23 }
  0xad   :  { %v63_v26 = vmul.f32 %v44_v24, %v44_v24 }
  0xae   :  { %v61_v25 = vpop.xlane.xlu0 %60 }
  0xaf   :  { %v62_v27 = vmul.f32 0.001953125, %v61_v25 }
  0xb1   :  { %v64_v28 = vsub.f32 %v62_v27, %v63_v26 }
  0xb3   :  { %v65_v29 = vmax.f32 %v64_v28, 0.0 }
  0xb5   :  { %v66_v30 = vadd.f32 1e-05, %v65_v29 }
  0xb7   :  { %135 = vrsqrt.f32 %v66_v30 }
  0xc1   :  { %v136_v33 = vpop.eup %135 }
  0xc2   :  { %v69_v34 = vmul.f32 %v136_v33, %v68_v32 }
  0xc4   :  { %v70_v35 = vmul.f32 %v69_v34, %v44_v24 }
  0xc6   :  { %72 = vrot.lane.b32.xlu1 %v70_v35, %s190_s24 }
  0xca   :  { %78 = vperm.xlu1 %131, %v69_v34  }
 0x138   :  { %v73_v36 = vpop.permute.xlu1 %72 }
 0x139   :  { %v75_v37 = vsub.f32 %v68_v32, %v73_v36 }
 0x13b   :  { %92 = vperm.xlu0 %132, %v75_v37  }
 0x149   :  { %v79_v44 = vpop.permute.xlu1 %78 }
 0x14a   :  { %v86_v45 = vrot.slane %v79_v44, %v85_v43 }
 0x14c   :  { %v88_v47 = vmul.f32 %v86_v45, %v26_v0  ;;  %v89_v48 = vmul.f32 %v86_v45, %v27_v1 }
 0x1ba   :  { %v93_v46 = vpop.permute.xlu0 %92 }
 0x1bb   :  { %v100_v49 = vrot.slane %v93_v46, %v85_v43 }
 0x1bd   :  { %v102_v50 = vadd.f32 %v100_v49, %v88_v47  ;;  %v103_v51 = vadd.f32 %v100_v49, %v89_v48 }
 0x1bf   :  { %104 = vst [vmem:[#allocation5] sm:$0xff] %v102_v50  ;;  %105 = vst [vmem:[#allocation5 + $0x8] sm:$0xff] %v103_v51 }
 0x1c0   :  { %170 = shalt.err (!%p167_p12)
}
 0x1c1   :  { %s171_s29 = scalar_lea.hbm %s251_s2, 256 }
 0x1c2   :  { %p172_p13 = scmp.ne.s32.totalorder %s251_s2, %s171_s29  ;;  %p175_p0 = scmp.lt.u32.totalorder %s171_s29, %s251_s2 }
 0x1c4   :  { %p177_p1 = pnand %p175_p0, %p172_p13 }
 0x1c6   :  { %180 = shalt.err (!%p177_p1)
}
 0x1c7   :  { %117 = dma.vmem_to_hbm [thread:$0]  %s112_s1, 256, %s251_s2, [#allocation4], %s186_s19, %s186_s19, %s187_s20  }
 0x1c8   :  { %183 = dma.done.wait [#allocation4], 256  }
 0x1c9   :  { %184 = vsyncadd [#allocation4], 4294967040 }
 0x1ca   :  { %121 = vsyncpa [#allocation3], 1 }
 0x1cb   :  { %122 = vsyncpa [#allocation4], 1 }

</bundles_post_ra>
